<compile_context>
chip_gen: v7x
topology: tpu7x:2x2x1
jax: 0.10.0
libtpu: 0.0.40
codegen_flags: <defaults>
</compile_context>

<pallas_src>
import jax
import jax.numpy as jnp
from jax.experimental import pallas as pl
from jax.experimental.pallas import tpu as pltpu


_SUBLANE = 8  # second-to-last dim alignment (sublane width)


def _round_up(n, m):
    return ((n + m - 1) // m) * m


def _pad_axis(a, axis, multiple):
    size = a.shape[axis]
    pad = _round_up(size, multiple) - size
    if pad == 0:
        return a
    widths = [(0, 0)] * a.ndim
    widths[axis] = (0, pad)
    return jnp.pad(a, widths)


def _make_fused_kernel(num_layers):
    """Kernel body: out = relu(... relu(relu(x @ W0 + b0) @ W1 + b1) ...)."""

    def kernel(*refs):
        # refs = (x, w0, b0, w1, b1, ..., out) -- all VMEM tiles.
        x_ref, o_ref = refs[0], refs[-1]
        h = x_ref[...].astype(jnp.float32)
        for i in range(num_layers):
            w_ref = refs[1 + 2 * i]
            b_ref = refs[2 + 2 * i]
            # MXU matmul in the weight dtype (f32 or bf16 operands) with f32
            # accumulation; bias + ReLU stay in f32 on the VPU.
            lhs = h.astype(w_ref.dtype)
            h = jnp.dot(lhs, w_ref[...], preferred_element_type=jnp.float32)
            h = jnp.maximum(h + b_ref[...].astype(jnp.float32), 0.0)
        o_ref[...] = h.astype(o_ref.dtype)

    return kernel


def init_dnn_params(key, hidden_units):
    """Deterministic init matching nn.Linear shapes (weight stored transposed)."""
    params = []
    for i in range(len(hidden_units) - 1):
        fin, fout = hidden_units[i], hidden_units[i + 1]
        key, kw, kb = jax.random.split(key, 3)
        bound = 1.0 / jnp.sqrt(fin)
        w = jax.random.uniform(kw, (fin, fout), jnp.float32, -bound, bound)
        b = jax.random.uniform(kb, (1, fout), jnp.float32, -bound, bound)
        params.append((w, b))
    return params


def cast_params_bf16(params):
    """One-time param prep: bf16 MXU operands (v6e/v7x lever); do this once,
    outside the per-step forward, not per call."""
    return [(w.astype(jnp.bfloat16), b.astype(jnp.bfloat16)) for w, b in params]


def dnn_forward(x, params, dropout=0.0, *, batch_tile=1024):
    """Fused forward pass of the Dnn tower.

    x: [B, Fin]; params: list of (w: [Fin_i, Fout_i], b: [1, Fout_i]).
    dropout=0.0 -> identity (matches the PyTorch module's default / eval).
    """
    if dropout != 0.0:
        # TODO(synk): implement training-mode dropout in-kernel with
        # pltpu.prng_seed + pltpu.stateful_bernoulli keep-mask.
        raise NotImplementedError(
            "dropout > 0 not implemented; p=0.0 (module default / eval) is the identity.")

    B, fin = x.shape
    fout = params[-1][0].shape[1]
    num_layers = len(params)
    batch_tile = _round_up(batch_tile, _SUBLANE)

    # No feature-dim padding: narrow (32/64-wide) blocks are legal because the
    # last block dim equals the full array dim; Mosaic masks in vregs.
    flat = [x]
    for w, b in params:
        flat.append(w)
        flat.append(b)

    kernel = _make_fused_kernel(num_layers)
    out_dtype = x.dtype

    if B <= batch_tile:
        # Small batch: single invocation, whole-array VMEM refs, no grid and
        # no pipelining machinery.  Pad batch only to a sublane multiple (8).
        bp = _round_up(B, _SUBLANE)
        flat[0] = _pad_axis(x, 0, _SUBLANE)
        out = pl.pallas_call(
            kernel,
            out_shape=jax.ShapeDtypeStruct((bp, fout), out_dtype),
            in_specs=[pl.BlockSpec(memory_space=pltpu.MemorySpace.VMEM)] * len(flat),
            out_specs=pl.BlockSpec(memory_space=pltpu.MemorySpace.VMEM),
        )(*flat)
        return out[:B]

    # Production-sized batch: tile x/out over batch with a cdiv grid (ragged
    # last block, no batch padding).  Weights/biases map to block (0, 0) so
    # they stay resident in VMEM across all batch tiles.
    grid = pl.cdiv(B, batch_tile)
    in_specs = [pl.BlockSpec((batch_tile, fin), lambda i: (i, 0))]
    for a in flat[1:]:
        in_specs.append(pl.BlockSpec(a.shape, lambda i: (0, 0)))
    out = pl.pallas_call(
        kernel,
        out_shape=jax.ShapeDtypeStruct((B, fout), out_dtype),
        grid=(grid,),
        in_specs=in_specs,
        out_specs=pl.BlockSpec((batch_tile, fout), lambda i: (i, 0)),
        compiler_params=pltpu.CompilerParams(
            # Batch axis is embarrassingly parallel -> megacore sharding (v7x).
            dimension_semantics=("parallel",),
            # Tiny footprint: resident weights + double-buffered x/out tiles
            # are well under 32 MiB, which is valid on every generation
            # (v7x has 64 MiB physical / 32 MiB scoped default).
            vmem_limit_bytes=32 * 1024 * 1024,
        ),
    )(*flat)
    return out  # already (B, fout): no slice / post-pass needed


if __name__ == "__main__":
    # Shapes consistent with the module: hidden_units=[32, 64, 32].
    hidden_units = [32, 64, 32]

    key = jax.random.PRNGKey(0)
    key, kx = jax.random.split(key)
    params = init_dnn_params(key, hidden_units)

    def ref_forward(xin, ps):
        h = xin
        for w, b in ps:
            h = jnp.maximum(h @ w + b, 0.0)
        return h

    # --- small batch: single fused, no-grid kernel path ---
    batch = 8
    x_small = jax.random.normal(kx, (batch, hidden_units[0]), jnp.float32)
    out_small = jax.block_until_ready(dnn_forward(x_small, params))
    assert out_small.shape == (batch, hidden_units[-1])
    assert jnp.allclose(out_small, ref_forward(x_small, params), atol=1e-4, rtol=1e-4)

    # --- larger, ragged batch: batch-tiled grid path (weights resident,
    #     parallel axis, cdiv grid with a partial last block) ---
    key, kx2 = jax.random.split(key)
    big_batch = 600  # 600 = 2*256 + 88 -> exercises the ragged last block
    x_big = jax.random.normal(kx2, (big_batch, hidden_units[0]), jnp.float32)
    out_big = jax.block_until_ready(dnn_forward(x_big, params, batch_tile=256))
    assert out_big.shape == (big_batch, hidden_units[-1])
    assert jnp.allclose(out_big, ref_forward(x_big, params), atol=1e-4, rtol=1e-4)

    # --- bf16 MXU operands (v6e/v7x lever), f32 accumulation + f32 epilogue ---
    params_bf16 = cast_params_bf16(params)
    out_bf16 = jax.block_until_ready(dnn_forward(x_small, params_bf16))
    assert out_bf16.shape == (batch, hidden_units[-1])
    assert jnp.allclose(out_bf16, ref_forward(x_small, params), atol=5e-2, rtol=5e-2)

    print("KERNEL_OK")
</pallas_src>

<mosaic_0001>
module attributes {stable_mosaic.version = 11 : i64} {
  func.func @kernel(%arg0: memref<8x32xf32, #tpu.memory_space<vmem>>, %arg1: memref<32x64xf32, #tpu.memory_space<vmem>>, %arg2: memref<1x64xf32, #tpu.memory_space<vmem>>, %arg3: memref<64x32xf32, #tpu.memory_space<vmem>>, %arg4: memref<1x32xf32, #tpu.memory_space<vmem>>, %arg5: memref<8x32xf32, #tpu.memory_space<vmem>>) attributes {dimension_semantics = [], scalar_prefetch = 0 : i64, scratch_operands = 0 : i64, tpu.core_type = #tpu.core_type<tc>} {
    %c0 = arith.constant 0 : index
    %c0_0 = arith.constant 0 : index
    %0 = vector.load %arg0[%c0, %c0_0] : memref<8x32xf32, #tpu.memory_space<vmem>>, vector<8x32xf32>
    %c0_1 = arith.constant 0 : index
    %c0_2 = arith.constant 0 : index
    %1 = vector.load %arg1[%c0_1, %c0_2] : memref<32x64xf32, #tpu.memory_space<vmem>>, vector<32x64xf32>
    %cst = arith.constant dense<0.000000e+00> : vector<8x64xf32>
    %2 = tpu.matmul %0, %1, %cst {dimension_numbers = #tpu.dot_dimension_numbers<[1], [0], [0], [1], [0, 0, 1, 1], [], []>} : vector<8x32xf32>, vector<32x64xf32>, vector<8x64xf32> -> vector<8x64xf32>
    %c0_3 = arith.constant 0 : index
    %c0_4 = arith.constant 0 : index
    %3 = vector.load %arg2[%c0_3, %c0_4] : memref<1x64xf32, #tpu.memory_space<vmem>>, vector<1x64xf32>
    %4 = vector.broadcast %3 : vector<1x64xf32> to vector<8x64xf32>
    %5 = arith.addf %2, %4 : vector<8x64xf32>
    %cst_5 = arith.constant 0.000000e+00 : f32
    %6 = vector.broadcast %cst_5 : f32 to vector<8x64xf32>
    %7 = arith.maximumf %5, %6 : vector<8x64xf32>
    %c0_6 = arith.constant 0 : index
    %c0_7 = arith.constant 0 : index
    %8 = vector.load %arg3[%c0_6, %c0_7] : memref<64x32xf32, #tpu.memory_space<vmem>>, vector<64x32xf32>
    %cst_8 = arith.constant dense<0.000000e+00> : vector<8x32xf32>
    %9 = tpu.matmul %7, %8, %cst_8 {dimension_numbers = #tpu.dot_dimension_numbers<[1], [0], [0], [1], [0, 0, 1, 1], [], []>} : vector<8x64xf32>, vector<64x32xf32>, vector<8x32xf32> -> vector<8x32xf32>
    %c0_9 = arith.constant 0 : index
    %c0_10 = arith.constant 0 : index
    %10 = vector.load %arg4[%c0_9, %c0_10] : memref<1x32xf32, #tpu.memory_space<vmem>>, vector<1x32xf32>
    %11 = vector.broadcast %10 : vector<1x32xf32> to vector<8x32xf32>
    %12 = arith.addf %9, %11 : vector<8x32xf32>
    %cst_11 = arith.constant 0.000000e+00 : f32
    %13 = vector.broadcast %cst_11 : f32 to vector<8x32xf32>
    %14 = arith.maximumf %12, %13 : vector<8x32xf32>
    %c0_12 = arith.constant 0 : index
    %c0_13 = arith.constant 0 : index
    %15 = vector.load %arg5[%c0_12, %c0_13] : memref<8x32xf32, #tpu.memory_space<vmem>>, vector<8x32xf32>
    tpu.vector_store %arg5[%c0_12, %c0_13], %14 {strides = array<i32>} : memref<8x32xf32, #tpu.memory_space<vmem>>, vector<8x32xf32>,
    return
  }
}

</mosaic_0001>

<bundles_post_ra>
// kernel: tpu_custom_call.1
= control target key start
LH: loop header
LB: loop body
LE: loop exit
PB: predicated region body
PF: predicated region fallthrough
CT: control target
= control target key end

     0   :  { %v307_v3 = vmov 0.0|0.0   ;;  %vm308_vm0 = vmmov 0   ;;  %v309_v6 = vmov 0.0   ;;  %s400_s0 = inlined_call_operand.vmem [shape: f32[8,32], index: 0, kind: input, shape index: {}]   ;;  %s401_s1 = inlined_call_operand.vmem [shape: f32[32,64], index: 1, kind: input, shape index: {}]   ;;  %s402_s2 = inlined_call_operand.vmem [shape: f32[1,64], index: 2, kind: input, shape index: {}]   ;;  %s403_s3 = inlined_call_operand.vmem [shape: f32[64,32], index: 3, kind: input, shape index: {}]   ;;  %s404_s4 = inlined_call_operand.vmem [shape: f32[1,32], index: 4, kind: input, shape index: {}]   ;;  %s405_s5 = inlined_call_operand.hbm [shape: f32[8,32], index: 5, kind: output, shape index: {}]  }
   0x1   :  { %v22_v0 = vld [vmem:[%s401_s1] sm:$0xff]  ;;  %v23_v1 = vld [vmem:[%s401_s1 + $0x8] sm:$0xff]  ;;  %v24_v2 = vld [vmem:[%s401_s1 + $0x10] sm:$0xff]  ;;  %261 = vmatprep.subr.bf16.mxu0 %v307_v3  ;;  %239 = vmatprep.mubr.msk.f32.mxu0 %vm308_vm0, %v309_v6 }
   0x2   :  { %v262_v4 = vpack.c.bf16 %v23_v1, %v22_v0  ;;  %v25_v5 = vld [vmem:[%s401_s1 + $0x18] sm:$0xff]  ;;  %v108_v7 = vld [vmem:[%s403_s3] sm:$0xff]  ;;  %267 = vmatprep.subr.bf16.mxu1 %v307_v3  ;;  %v109_v8 = vld [vmem:[%s403_s3 + $0x8] sm:$0xff]  ;;  %258 = vmatprep.mubr.msk.f32.mxu1 %vm308_vm0, %v309_v6 }
   0x3   :  { %v110_v9 = vld [vmem:[%s403_s3 + $0x10] sm:$0xff]  ;;  %v111_v10 = vld [vmem:[%s403_s3 + $0x18] sm:$0xff]  ;;  %v265_v11 = vpack.c.bf16 %v25_v5, %v24_v2  ;;  %v268_v12 = vpack.c.bf16 %v109_v8, %v108_v7 }
   0x4   :  { %263 = vmatpush3.bf16.msra.mxu0 %v262_v4 }
   0x5   :  { %264 = vmatprep.subr.bf16.mxu0 %v307_v3 }
   0x6   :  { %10 = vsyncpa [#allocation3], 0  ;;  %269 = vmatpush3.bf16.msra.mxu1 %v268_v12  ;;  %v271_v13 = vpack.c.bf16 %v111_v10, %v110_v9  ;;  %v112_v14 = vld [vmem:[%s403_s3 + $0x20] sm:$0xff]  ;;  %v113_v15 = vld [vmem:[%s403_s3 + $0x28] sm:$0xff]  ;;  %vm33_vm1 = vcmask 261120   ;;  %vm123_vm2 = vcmask 523264  }
   0x7   :  { %270 = vmatprep.subr.bf16.mxu1 %v307_v3  ;;  %v21_v16 = vld [vmem:[%s400_s0] sm:$0xff]  ;;  %v274_v17 = vpack.c.bf16 %v113_v15, %v112_v14  ;;  %v114_v18 = vld [vmem:[%s403_s3 + $0x30] sm:$0xff]  ;;  %v115_v19 = vld [vmem:[%s403_s3 + $0x38] sm:$0xff]  ;;  %s310_s21 = smov [#allocation2]  }
   0x8   :  { %266 = vmatpush3.bf16.msra.mxu0 %v265_v11  ;;  %v277_v20 = vpack.c.bf16 %v115_v19, %v114_v18  ;;  %v213_v21 = vld [vmem:[%s402_s2] ss:$0 sm:$0xff]  ;;  %s205_s22 = sshll.u32 %s310_s21, 4  ;;  %s206_s22 = int_to_ptr.vmem [resolvable:$true] %s205_s22 }
   0x9   :  { %v215_v26 = vld [vmem:[%s404_s4] ss:$0 sm:$0xff]  ;;  %s283_s2 = scalar_lea.vmem %s206_s22, 128  ;;  %p288_p1 = scmp.lt.s32.totalorder %s206_s22, %s206_s22 }
   0xa   :  { %272 = vmatpush3.bf16.msra.mxu1 %v271_v13  ;;  %p284_p0 = scmp.ne.s32.totalorder %s206_s22, %s283_s2  ;;  %p289_p2 = scmp.lt.s32.totalorder %s283_s2, %s283_s2 }
   0xb   :  { %240 = vmatmul.mubr.msk.f32.vlgmr.msra.gmra.mrb[0].mxu0 %vm33_vm1, %v21_v16  ;;  %273 = vmatprep.subr.bf16.mxu1 %v307_v3 }
   0xc   :  { %p290_p3 = por %p289_p2, %p288_p1 }
   0xe   :  { %275 = vmatpush3.bf16.msra.mxu1 %v274_v17  ;;  %p291_p4 = pnand %p290_p3, %p284_p0 }
   0xf   :  { %276 = vmatprep.subr.bf16.mxu1 %v307_v3 }
  0x12   :  { %278 = vmatpush3.bf16.msra.mxu1 %v277_v20 }
  0xde   :  { %v103_v22 = vpop.f32.mrb[0].mxu0 }
  0xdf   :  { %v104_v23 = vadd.f32 %v213_v21, %v103_v22  ;;  %v241_v24 = vpop.f32.mrb[1].mxu0 }
  0xe1   :  { %v107_v25 = vmax.f32 %v104_v23, 0.0 }
  0xe3   :  { %259 = vmatmul.mubr.msk.f32.vlgmr.msra.gmra.mrb[0].mxu1 %vm123_vm2, %v107_v25 }
 0x1b6   :  { %v193_v27 = vpop.f32.mrb[0].mxu1 }
 0x1b7   :  { %v194_v28 = vadd.f32 %v215_v26, %v193_v27  ;;  %v260_v29 = vpop.f32.mrb[1].mxu1 }
 0x1b9   :  { %v197_v30 = vmax.f32 %v194_v28, 0.0 }
 0x1bb   :  { %198 = vst.msk [vmem:[#allocation2] sm:$0xff] %vm33_vm1, %v197_v30 }
 0x1bc   :  { %294 = shalt.err (!%p291_p4)
}
 0x1bd   :  { %s295_s4 = scalar_lea.hbm %s405_s5, 128 }
 0x1be   :  { %p296_p5 = scmp.ne.s32.totalorder %s405_s5, %s295_s4  ;;  %p299_p6 = scmp.lt.u32.totalorder %s295_s4, %s405_s5 }
 0x1c0   :  { %p301_p7 = pnand %p299_p6, %p296_p5 }
 0x1c2   :  { %304 = shalt.err (!%p301_p7)
}
 0x1c3   :  { %208 = dma.vmem_to_hbm [thread:$0]  %s206_s22, 128, %s405_s5, [#allocation3]  }
 0x1c4   :  { %305 = dma.done.wait [#allocation3], 128  }
 0x1c5   :  { %306 = vsyncadd [#allocation3], 4294967168 }
 0x1c6   :  { %212 = vsyncpa [#allocation3], 1 }

</bundles_post_ra>
